<compile_context>
chip_gen: v7x
topology: tpu7x:2x2x1
jax: 0.10.0
libtpu: 0.0.40
codegen_flags: <defaults>
</compile_context>

<pallas_src>
import math

import jax
import jax.numpy as jnp
from jax.experimental import pallas as pl
from jax.experimental.pallas import tpu as pltpu


_GELU_C = math.sqrt(2.0 / math.pi)  # 0.7978845608028654


def _round_up(x, m):
    return ((x + m - 1) // m) * m


def _cdiv(a, b):
    return -(-a // b)


def _pick_hidden_chunk(H, target):
    """Largest multiple of 128 <= target that divides H; else H (resident)."""
    if H <= target:
        return H
    top = (min(target, H) // 128) * 128
    for tk in range(top, 127, -128):
        if H % tk == 0:
            return tk
    return H


def _vmem_capacity_bytes():
    try:
        info = pltpu.get_tpu_info()
        cap = getattr(info, "vmem_capacity_bytes", None)
        if cap:
            return int(cap)
    except Exception:
        pass
    return 64 * 1024 * 1024  # conservative: v7x per-TC VMEM


def _ffn_kernel(x_ref, w1_ref, b1_ref, w2_ref, b2_ref, o_ref, acc_ref):
    """One (row tile, hidden chunk) step of  o = GELU(x@W1+b1) @ W2 + b2."""
    k = pl.program_id(1)

    @pl.when(k == 0)
    def _():
        acc_ref[...] = jnp.zeros_like(acc_ref)

    # ---- first matmul chunk: native-dtype operands, f32 accumulation (MXU) ----
    h = jnp.dot(x_ref[...], w1_ref[...], preferred_element_type=jnp.float32)
    h = h + b1_ref[...].astype(jnp.float32)                 # [tm, tk] f32

    # ---- tanh-approx GELU, factored; tanh lands on the EUP slot ----
    h = 0.5 * h * (1.0 + jnp.tanh(_GELU_C * h * (1.0 + 0.044715 * (h * h))))

    # (dropout: identity in eval mode)

    # ---- second matmul chunk, accumulate in f32 VMEM scratch ----
    acc_ref[...] += jnp.dot(h.astype(w2_ref.dtype), w2_ref[...],
                            preferred_element_type=jnp.float32)

    @pl.when(k == pl.num_programs(1) - 1)
    def _():
        o_ref[...] = (acc_ref[...] + b2_ref[...].astype(jnp.float32)).astype(o_ref.dtype)


def feed_forward(x, w1, b1, w2, b2, *, tile_m=256, hidden_chunk=512):
    """x: [B, S, D];  w1: [D, H], b1: [1, H];  w2: [H, D], b2: [1, D]."""
    B, S, D = x.shape
    Din, H = w1.shape
    assert Din == D and w2.shape == (H, D) and b1.shape == (1, H) and b2.shape == (1, D)
    N = B * S
    x2 = x.reshape(N, D)

    in_item = jnp.dtype(x.dtype).itemsize
    w_item = jnp.dtype(w1.dtype).itemsize
    out_item = in_item

    # Sublane packing: f32 -> 8, bf16 -> 16.
    sub = max(8, 32 // in_item)

    # ---- row tiling (no wrapper-side pad/slice) ----
    if N <= tile_m:
        tm = N                                  # block dim == array dim: always legal
    else:
        tm = _round_up(min(tile_m, N), sub)     # ragged tail handled by bounded DMA
    n_rows = _cdiv(N, tm)
    # Give the v7x megacore ("parallel" row axis, 2 TCs) >=2 row tiles when cheap.
    if n_rows == 1 and N >= 256:
        tm = _round_up((N + 1) // 2, sub)
        n_rows = _cdiv(N, tm)

    # ---- hidden-dimension chunking ----
    tk = _pick_hidden_chunk(H, hidden_chunk)
    n_k = H // tk
    resident = (n_k == 1)

    # Grid-invariant operands keep a single VMEM buffer; streamed ones double-buffer.
    w_mode = pl.Buffered(1) if resident else None
    b2_mode = pl.Buffered(1)

    # ---- generation-aware VMEM budget ----
    weight_bufs = 1 if resident else 2
    need = (
        2 * tm * D * in_item                      # x double buffer
        + 2 * tm * D * out_item                   # out double buffer
        + weight_bufs * (D * tk + tk * D) * w_item  # W1/W2 chunks
        + 2 * (tk + D) * w_item                   # biases
        + tm * D * 4                              # f32 accumulator scratch
        + 2 * tm * tk * 4                         # f32 h + GELU staging
    )
    cap = _vmem_capacity_bytes()
    vmem_limit = int(min(max(int(need * 1.5) + (4 << 20), 32 << 20), int(cap * 0.85)))

    cost = pl.CostEstimate(
        flops=4 * N * D * H,                      # two matmuls, 2 flops/MAC
        transcendentals=N * H,                    # tanh in GELU
        bytes_accessed=(N * D * (in_item + out_item)
                        + 2 * D * H * w_item
                        + (H + D) * w_item),
    )

    out = pl.pallas_call(
        _ffn_kernel,
        out_shape=jax.ShapeDtypeStruct((N, D), x.dtype),
        grid_spec=pltpu.PrefetchScalarGridSpec(
            num_scalar_prefetch=0,
            grid=(n_rows, n_k),
            in_specs=[
                pl.BlockSpec((tm, D), lambda i, k: (i, 0)),                        # x row tile
                pl.BlockSpec((D, tk), lambda i, k: (0, k), pipeline_mode=w_mode),  # W1 chunk
                pl.BlockSpec((1, tk), lambda i, k: (0, k), pipeline_mode=w_mode),  # b1 chunk
                pl.BlockSpec((tk, D), lambda i, k: (k, 0), pipeline_mode=w_mode),  # W2 chunk
                pl.BlockSpec((1, D), lambda i, k: (0, 0), pipeline_mode=b2_mode),  # b2
            ],
            out_specs=pl.BlockSpec((tm, D), lambda i, k: (i, 0)),
            scratch_shapes=[pltpu.VMEM((tm, D), jnp.float32)],
        ),
        compiler_params=pltpu.CompilerParams(
            dimension_semantics=("parallel", "arbitrary"),
            vmem_limit_bytes=vmem_limit,
        ),
        cost_estimate=cost,
    )(x2, w1, b1, w2, b2)

    return out.reshape(B, S, D)


def _reference(x, w1, b1, w2, b2):
    """Pure-JAX mirror of FeedForward.forward (glu=False, eval mode)."""
    B, S, D = x.shape
    x2 = x.reshape(B * S, D)
    h = jnp.dot(x2, w1, preferred_element_type=jnp.float32)
    h = h + b1.astype(jnp.float32)
    h = 0.5 * h * (1.0 + jnp.tanh(_GELU_C * (h + 0.044715 * (h * h * h))))
    y = jnp.dot(h.astype(w2.dtype), w2, preferred_element_type=jnp.float32)
    y = y + b2.astype(jnp.float32)
    return y.reshape(B, S, D)


if __name__ == "__main__":
    B, S, D = 2, 8, 128      # batch, seq, model dim (lane-dense D)
    MULT = 4
    H = D * MULT             # hidden dim of the FFN

    key = jax.random.PRNGKey(0)
    kx, kw1, kb1, kw2, kb2 = jax.random.split(key, 5)

    x = jax.random.normal(kx, (B, S, D), dtype=jnp.float32)
    w1 = jax.random.normal(kw1, (D, H), dtype=jnp.float32) / jnp.sqrt(jnp.float32(D))
    b1 = jax.random.normal(kb1, (1, H), dtype=jnp.float32) * 0.01
    w2 = jax.random.normal(kw2, (H, D), dtype=jnp.float32) / jnp.sqrt(jnp.float32(H))
    b2 = jax.random.normal(kb2, (1, D), dtype=jnp.float32) * 0.01

    ref = _reference(x, w1, b1, w2, b2)

    # ---- f32 path, weights fully resident (single hidden chunk) ----
    out = jax.block_until_ready(feed_forward(x, w1, b1, w2, b2))
    assert out.shape == (B, S, D)
    assert jnp.allclose(out.astype(jnp.float32), ref, atol=2e-3, rtol=2e-3), \
        "Pallas kernel (f32, resident weights) does not match reference"

    # ---- f32 path with hidden-dim streaming (2 chunks, exercises k-accumulation) ----
    out_s = jax.block_until_ready(feed_forward(x, w1, b1, w2, b2, hidden_chunk=256))
    assert jnp.allclose(out_s.astype(jnp.float32), ref, atol=2e-3, rtol=2e-3), \
        "Pallas kernel (f32, streamed hidden dim) does not match reference"

    # ---- bf16 operand path (native MXU dtype, f32 accumulation) ----
    xb, w1b, b1b, w2b, b2b = (a.astype(jnp.bfloat16) for a in (x, w1, b1, w2, b2))
    out_bf = jax.block_until_ready(feed_forward(xb, w1b, b1b, w2b, b2b))
    ref_bf = _reference(xb, w1b, b1b, w2b, b2b)
    assert out_bf.dtype == jnp.bfloat16
    assert jnp.allclose(out_bf.astype(jnp.float32), ref_bf, atol=5e-2, rtol=5e-2), \
        "Pallas kernel (bf16) does not match reference"

    print("KERNEL_OK")
</pallas_src>

<mosaic_0001>
module attributes {stable_mosaic.version = 11 : i64} {
  func.func @_ffn_kernel(%arg0: i32, %arg1: i32, %arg2: memref<16x128xf32, #tpu.memory_space<vmem>>, %arg3: memref<128x512xf32, #tpu.memory_space<vmem>>, %arg4: memref<1x512xf32, #tpu.memory_space<vmem>>, %arg5: memref<512x128xf32, #tpu.memory_space<vmem>>, %arg6: memref<1x128xf32, #tpu.memory_space<vmem>>, %arg7: memref<16x128xf32, #tpu.memory_space<vmem>>, %arg8: memref<16x128xf32, #tpu.memory_space<vmem>>) attributes {dimension_semantics = [#tpu.dimension_semantics<parallel>, #tpu.dimension_semantics<arbitrary>], iteration_bounds = array<i64: 1, 1>, scalar_prefetch = 0 : i64, scratch_operands = 1 : i64, tpu.core_type = #tpu.core_type<tc>, window_params = [{transform_indices = @transform_0, window_bounds = array<i64: 16, 128>}, {pipeline_mode = #tpu.pipeline_mode<synchronous>, transform_indices = @transform_1, window_bounds = array<i64: 128, 512>}, {pipeline_mode = #tpu.pipeline_mode<synchronous>, transform_indices = @transform_2, window_bounds = array<i64: 1, 512>}, {pipeline_mode = #tpu.pipeline_mode<synchronous>, transform_indices = @transform_3, window_bounds = array<i64: 512, 128>}, {pipeline_mode = #tpu.pipeline_mode<synchronous>, transform_indices = @transform_4, window_bounds = array<i64: 1, 128>}, {transform_indices = @transform_5, window_bounds = array<i64: 16, 128>}]} {
    %c0_i32 = arith.constant 0 : i32
    %0 = arith.cmpi eq, %arg1, %c0_i32 : i32
    %1 = arith.extui %0 : i1 to i32
    %c0_i32_0 = arith.constant 0 : i32
    %2 = arith.cmpi ne, %1, %c0_i32_0 : i32
    scf.if %2 {
      %cst_20 = arith.constant 0.000000e+00 : f32
      %31 = vector.broadcast %cst_20 : f32 to vector<16x128xf32>
      %c0_21 = arith.constant 0 : index
      %c0_22 = arith.constant 0 : index
      %32 = vector.load %arg8[%c0_21, %c0_22] : memref<16x128xf32, #tpu.memory_space<vmem>>, vector<16x128xf32>
      tpu.vector_store %arg8[%c0_21, %c0_22], %31 {strides = array<i32>} : memref<16x128xf32, #tpu.memory_space<vmem>>, vector<16x128xf32>,
    } else {
    }
    %c0 = arith.constant 0 : index
    %c0_1 = arith.constant 0 : index
    %3 = vector.load %arg2[%c0, %c0_1] : memref<16x128xf32, #tpu.memory_space<vmem>>, vector<16x128xf32>
    %c0_2 = arith.constant 0 : index
    %c0_3 = arith.constant 0 : index
    %4 = vector.load %arg3[%c0_2, %c0_3] : memref<128x512xf32, #tpu.memory_space<vmem>>, vector<128x512xf32>
    %cst = arith.constant dense<0.000000e+00> : vector<16x512xf32>
    %5 = tpu.matmul %3, %4, %cst {dimension_numbers = #tpu.dot_dimension_numbers<[1], [0], [0], [1], [0, 0, 1, 1], [], []>} : vector<16x128xf32>, vector<128x512xf32>, vector<16x512xf32> -> vector<16x512xf32>
    %c0_4 = arith.constant 0 : index
    %c0_5 = arith.constant 0 : index
    %6 = vector.load %arg4[%c0_4, %c0_5] : memref<1x512xf32, #tpu.memory_space<vmem>>, vector<1x512xf32>
    %7 = vector.broadcast %6 : vector<1x512xf32> to vector<16x512xf32>
    %8 = arith.addf %5, %7 : vector<16x512xf32>
    %cst_6 = arith.constant 5.000000e-01 : f32
    %9 = vector.broadcast %cst_6 : f32 to vector<16x512xf32>
    %10 = arith.mulf %9, %8 : vector<16x512xf32>
    %cst_7 = arith.constant 0.797884583 : f32
    %11 = vector.broadcast %cst_7 : f32 to vector<16x512xf32>
    %12 = arith.mulf %11, %8 : vector<16x512xf32>
    %13 = arith.mulf %8, %8 : vector<16x512xf32>
    %cst_8 = arith.constant 4.471500e-02 : f32
    %14 = vector.broadcast %cst_8 : f32 to vector<16x512xf32>
    %15 = arith.mulf %14, %13 : vector<16x512xf32>
    %cst_9 = arith.constant 1.000000e+00 : f32
    %16 = vector.broadcast %cst_9 : f32 to vector<16x512xf32>
    %17 = arith.addf %16, %15 : vector<16x512xf32>
    %18 = arith.mulf %12, %17 : vector<16x512xf32>
    %19 = math.tanh %18 : vector<16x512xf32>
    %cst_10 = arith.constant 1.000000e+00 : f32
    %20 = vector.broadcast %cst_10 : f32 to vector<16x512xf32>
    %21 = arith.addf %20, %19 : vector<16x512xf32>
    %22 = arith.mulf %10, %21 : vector<16x512xf32>
    %c0_11 = arith.constant 0 : index
    %c0_12 = arith.constant 0 : index
    %23 = vector.load %arg8[%c0_11, %c0_12] : memref<16x128xf32, #tpu.memory_space<vmem>>, vector<16x128xf32>
    %c0_13 = arith.constant 0 : index
    %c0_14 = arith.constant 0 : index
    %24 = vector.load %arg5[%c0_13, %c0_14] : memref<512x128xf32, #tpu.memory_space<vmem>>, vector<512x128xf32>
    %cst_15 = arith.constant dense<0.000000e+00> : vector<16x128xf32>
    %25 = tpu.matmul %22, %24, %cst_15 {dimension_numbers = #tpu.dot_dimension_numbers<[1], [0], [0], [1], [0, 0, 1, 1], [], []>} : vector<16x512xf32>, vector<512x128xf32>, vector<16x128xf32> -> vector<16x128xf32>
    %26 = arith.addf %23, %25 : vector<16x128xf32>
    %c0_16 = arith.constant 0 : index
    %c0_17 = arith.constant 0 : index
    %27 = vector.load %arg8[%c0_16, %c0_17] : memref<16x128xf32, #tpu.memory_space<vmem>>, vector<16x128xf32>
    tpu.vector_store %arg8[%c0_16, %c0_17], %26 {strides = array<i32>} : memref<16x128xf32, #tpu.memory_space<vmem>>, vector<16x128xf32>,
    %c0_i32_18 = arith.constant 0 : i32
    %28 = arith.cmpi eq, %arg1, %c0_i32_18 : i32
    %29 = arith.extui %28 : i1 to i32
    %c0_i32_19 = arith.constant 0 : i32
    %30 = arith.cmpi ne, %29, %c0_i32_19 : i32
    scf.if %30 {
      %c0_20 = arith.constant 0 : index
      %c0_21 = arith.constant 0 : index
      %31 = vector.load %arg8[%c0_20, %c0_21] : memref<16x128xf32, #tpu.memory_space<vmem>>, vector<16x128xf32>
      %c0_22 = arith.constant 0 : index
      %c0_23 = arith.constant 0 : index
      %32 = vector.load %arg6[%c0_22, %c0_23] : memref<1x128xf32, #tpu.memory_space<vmem>>, vector<1x128xf32>
      %33 = vector.broadcast %32 : vector<1x128xf32> to vector<16x128xf32>
      %34 = arith.addf %31, %33 : vector<16x128xf32>
      %c0_24 = arith.constant 0 : index
      %c0_25 = arith.constant 0 : index
      %35 = vector.load %arg7[%c0_24, %c0_25] : memref<16x128xf32, #tpu.memory_space<vmem>>, vector<16x128xf32>
      tpu.vector_store %arg7[%c0_24, %c0_25], %34 {strides = array<i32>} : memref<16x128xf32, #tpu.memory_space<vmem>>, vector<16x128xf32>,
    } else {
    }
    return
  }
  func.func @transform_0(%arg0: i32, %arg1: i32) -> (i32, i32) {
    %c0_i32 = arith.constant 0 : i32
    %c0_i32_0 = arith.constant 0 : i32
    return %arg0, %c0_i32 : i32, i32
  }
  func.func @transform_1(%arg0: i32, %arg1: i32) -> (i32, i32) {
    %c0_i32 = arith.constant 0 : i32
    %c0_i32_0 = arith.constant 0 : i32
    return %c0_i32, %arg1 : i32, i32
  }
  func.func @transform_2(%arg0: i32, %arg1: i32) -> (i32, i32) {
    %c0_i32 = arith.constant 0 : i32
    %c0_i32_0 = arith.constant 0 : i32
    return %c0_i32, %arg1 : i32, i32
  }
  func.func @transform_3(%arg0: i32, %arg1: i32) -> (i32, i32) {
    %c0_i32 = arith.constant 0 : i32
    %c0_i32_0 = arith.constant 0 : i32
    return %arg1, %c0_i32 : i32, i32
  }
  func.func @transform_4(%arg0: i32, %arg1: i32) -> (i32, i32) {
    %c0_i32 = arith.constant 0 : i32
    %c0_i32_0 = arith.constant 0 : i32
    %c0_i32_1 = arith.constant 0 : i32
    return %c0_i32, %c0_i32_0 : i32, i32
  }
  func.func @transform_5(%arg0: i32, %arg1: i32) -> (i32, i32) {
    %c0_i32 = arith.constant 0 : i32
    %c0_i32_0 = arith.constant 0 : i32
    return %arg0, %c0_i32 : i32, i32
  }
}

</mosaic_0001>

<bundles_post_ra>
// kernel: tpu_custom_call.1
= control target key start
LH: loop header
LB: loop body
LE: loop exit
PB: predicated region body
PF: predicated region fallthrough
CT: control target
= control target key end

     0   :  { %10 = vsyncpa [#allocation4], 0  ;;  %s1102_s0 = inlined_call_operand.hbm [shape: f32[16,128], index: 0, kind: input, shape index: {}]   ;;  %s1103_s1 = inlined_call_operand.hbm [shape: f32[128,512], index: 1, kind: input, shape index: {}]   ;;  %s1104_s2 = inlined_call_operand.vmem [shape: f32[1,512], index: 2, kind: input, shape index: {}]   ;;  %s1105_s3 = inlined_call_operand.hbm [shape: f32[512,128], index: 3, kind: input, shape index: {}]   ;;  %s1106_s4 = inlined_call_operand.vmem [shape: f32[1,128], index: 4, kind: input, shape index: {}]   ;;  %s1107_s5 = inlined_call_operand.hbm [shape: f32[16,128], index: 5, kind: output, shape index: {}]  }
   0x1   :  { %11 = vsyncpa [#allocation7], 0 }
   0x2   :  { %12 = vsyncpa [#allocation5], 0  ;;  %s960_s18 = smov [#allocation6]   ;;  %s866_s22 = scalar_lea.hbm %s1103_s1, 8192 }
   0x3   :  { %s30_s19 = sshll.u32 %s960_s18, 4  ;;  %p867_p0 = scmp.ne.s32.totalorder %s1103_s1, %s866_s22  ;;  %s31_s19 = int_to_ptr.vmem [resolvable:$true] %s30_s19 }
   0x4   :  { %p870_p1 = scmp.lt.u32.totalorder %s866_s22, %s1103_s1 }
   0x6   :  { %p872_p2 = pnand %p870_p1, %p867_p0 }
   0x8   :  { %875 = shalt.err (!%p872_p2)
}
   0x9   :  { %s876_s27 = scalar_lea.vmem %s31_s19, 8192  ;;  %p881_p4 = scmp.lt.s32.totalorder %s31_s19, %s31_s19 }
   0xa   :  { %p877_p3 = scmp.ne.s32.totalorder %s31_s19, %s876_s27  ;;  %p882_p5 = scmp.lt.s32.totalorder %s876_s27, %s876_s27 }
   0xc   :  { %p883_p6 = por %p882_p5, %p881_p4 }
   0xe   :  { %p884_p7 = pnand %p883_p6, %p877_p3 }
  0x10   :  { %887 = shalt.err (!%p884_p7)
}
  0x11   :  { %s961_s28 = smov 512   ;;  %s962_s29 = smov 32  }
  0x12   :  { %36 = dma.hbm_to_vmem [thread:$0]  %s1103_s1, 8192, %s31_s19, [#allocation7], %s961_s28, %s961_s28, %s962_s29  }
  0x13   :  { %s963_s7 = smov [#allocation3]   ;;  %s888_s11 = scalar_lea.hbm %s1102_s0, 256 }
  0x14   :  { %s18_s8 = sshll.u32 %s963_s7, 4  ;;  %p889_p8 = scmp.ne.s32.totalorder %s1102_s0, %s888_s11  ;;  %s19_s8 = int_to_ptr.vmem [resolvable:$true] %s18_s8 }
  0x15   :  { %p892_p9 = scmp.lt.u32.totalorder %s888_s11, %s1102_s0 }
  0x17   :  { %p894_p10 = pnand %p892_p9, %p889_p8 }
  0x19   :  { %897 = shalt.err (!%p894_p10)
}
  0x1a   :  { %s898_s16 = scalar_lea.vmem %s19_s8, 256  ;;  %p903_p12 = scmp.lt.s32.totalorder %s19_s8, %s19_s8 }
  0x1b   :  { %p899_p11 = scmp.ne.s32.totalorder %s19_s8, %s898_s16  ;;  %p904_p13 = scmp.lt.s32.totalorder %s898_s16, %s898_s16 }
  0x1d   :  { %p905_p0 = por %p904_p13, %p903_p12 }
  0x1f   :  { %p906_p1 = pnand %p905_p0, %p899_p11 }
  0x21   :  { %909 = shalt.err (!%p906_p1)
}
  0x22   :  { %s964_s1 = smov 128   ;;  %s965_s17 = smov 8  }
  0x23   :  { %24 = dma.hbm_to_vmem [thread:$0]  %s1102_s0, 256, %s19_s8, [#allocation4], %s964_s1, %s964_s1, %s965_s17  }
  0x24   :  { %s966_s20 = smov [#allocation8]   ;;  %s910_s24 = scalar_lea.hbm %s1105_s3, 8192 }
  0x25   :  { %s44_s21 = sshll.u32 %s966_s20, 4  ;;  %p911_p2 = scmp.ne.s32.totalorder %s1105_s3, %s910_s24  ;;  %s45_s21 = int_to_ptr.vmem [resolvable:$true] %s44_s21 }
  0x26   :  { %p914_p3 = scmp.lt.u32.totalorder %s910_s24, %s1105_s3 }
  0x28   :  { %p916_p4 = pnand %p914_p3, %p911_p2 }
  0x2a   :  { %919 = shalt.err (!%p916_p4)
}
  0x2b   :  { %s920_s29 = scalar_lea.vmem %s45_s21, 8192  ;;  %p925_p6 = scmp.lt.s32.totalorder %s45_s21, %s45_s21 }
  0x2c   :  { %p921_p5 = scmp.ne.s32.totalorder %s45_s21, %s920_s29  ;;  %p926_p7 = scmp.lt.s32.totalorder %s920_s29, %s920_s29 }
  0x2e   :  { %p927_p8 = por %p926_p7, %p925_p6 }
  0x30   :  { %p928_p9 = pnand %p927_p8, %p921_p5 }
  0x32   :  { %931 = shalt.err (!%p928_p9)
}
  0x33   :  { %50 = dma.hbm_to_vmem [thread:$0]  %s1105_s3, 8192, %s45_s21, [#allocation7], %s964_s1, %s964_s1, %s965_s17  }
  0x34   :  { %954 = dma.done.wait [#allocation4], 256  }
  0x35   :  { %955 = vsyncadd [#allocation4], 4294967040 }
  0x36   :  { %956 = dma.done.wait [#allocation7], 16384  }
  0x37   :  { %957 = vsyncadd [#allocation7], 4294950912  ;;  %v967_v0 = vmov 0.0   ;;  %v71_v1 = vld [vmem:[#allocation6 + $0x8] sm:$0xff]  ;;  %v73_v3 = vld [vmem:[#allocation6 + $0x18] sm:$0xff]  ;;  %s968_s8 = smov [#allocation9]  }
  0x38   :  { %220 = vmatprep.mubr.f32.mxu0 %v967_v0  ;;  %297 = vmatprep.mubr.f32.mxu1 %v967_v0  ;;  %v75_v2 = vld [vmem:[#allocation6 + $0x28] sm:$0xff]  ;;  %v77_v5 = vld [vmem:[#allocation6 + $0x38] sm:$0xff]  ;;  %v70_v6 = vld [vmem:[#allocation6] sm:$0xff]  ;;  %s623_s9 = sshll.u32 %s968_s8, 4  ;;  %s624_s9 = int_to_ptr.vmem [resolvable:$true] %s623_s9 }
  0x39   :  { %v713_v4 = vpack.c.bf16 %v75_v2, %v71_v1  ;;  %v74_v7 = vld [vmem:[#allocation6 + $0x20] sm:$0xff]  ;;  %v745_v8 = vpack.c.bf16 %v77_v5, %v73_v3  ;;  %v72_v10 = vld [vmem:[#allocation6 + $0x10] sm:$0xff]  ;;  %v79_v12 = vld [vmem:[#allocation6 + $0x48] sm:$0xff]  ;;  %s932_s10 = scalar_lea.vmem %s624_s9, 256  ;;  %p937_p11 = scmp.lt.s32.totalorder %s624_s9, %s624_s9 }
  0x3a   :  { %v715_v9 = vpack.c.bf16 %v74_v7, %v70_v6  ;;  %v76_v11 = vld [vmem:[#allocation6 + $0x30] sm:$0xff]  ;;  %v83_v14 = vld [vmem:[#allocation6 + $0x68] sm:$0xff]  ;;  %v81_v15 = vld [vmem:[#allocation6 + $0x58] sm:$0xff]  ;;  %p933_p10 = scmp.ne.s32.totalorder %s624_s9, %s932_s10  ;;  %p938_p12 = scmp.lt.s32.totalorder %s932_s10, %s932_s10 }
  0x3b   :  { %714 = vmatprep.subr.bf16.mxu0 %v713_v4  ;;  %v747_v13 = vpack.c.bf16 %v76_v11, %v72_v10  ;;  %v85_v16 = vld [vmem:[#allocation6 + $0x78] sm:$0xff]  ;;  %746 = vmatprep.subr.bf16.mxu1 %v745_v8  ;;  %v717_v17 = vpack.c.bf16 %v83_v14, %v79_v12  ;;  %v78_v19 = vld [vmem:[#allocation6 + $0x40] sm:$0xff]  ;;  %v80_v21 = vld [vmem:[#allocation6 + $0x50] sm:$0xff] }
  0x3c   :  { %716 = vmatpush1.bf16.msra.mxu0 %v715_v9  ;;  %v749_v18 = vpack.c.bf16 %v85_v16, %v81_v15  ;;  %v82_v20 = vld [vmem:[#allocation6 + $0x60] sm:$0xff]  ;;  %v84_v23 = vld [vmem:[#allocation6 + $0x70] sm:$0xff]  ;;  %v87_v24 = vld [vmem:[#allocation6 + $0x88] sm:$0xff]  ;;  %p939_p13 = por %p938_p12, %p937_p11 }
  0x3d   :  { %748 = vmatpush1.bf16.msra.mxu1 %v747_v13  ;;  %v719_v22 = vpack.c.bf16 %v82_v20, %v78_v19  ;;  %v91_v25 = vld [vmem:[#allocation6 + $0xa8] sm:$0xff]  ;;  %718 = vmatprep.subr.bf16.mxu0 %v717_v17  ;;  %v751_v26 = vpack.c.bf16 %v84_v23, %v80_v21  ;;  %v89_v28 = vld [vmem:[#allocation6 + $0x98] sm:$0xff]  ;;  %v86_v30 = vld [vmem:[#allocation6 + $0x80] sm:$0xff] }
  0x3e   :  { %750 = vmatprep.subr.bf16.mxu1 %v749_v18  ;;  %v721_v27 = vpack.c.bf16 %v91_v25, %v87_v24  ;;  %v93_v29 = vld [vmem:[#allocation6 + $0xb8] sm:$0xff]  ;;  %v90_v32 = vld [vmem:[#allocation6 + $0xa0] sm:$0xff]  ;;  %v88_v33 = vld [vmem:[#allocation6 + $0x90] sm:$0xff]  ;;  %p940_p0 = pnand %p939_p13, %p933_p10 }
  0x3f   :  { %v753_v31 = vpack.c.bf16 %v93_v29, %v89_v28  ;;  %v92_v34 = vld [vmem:[#allocation6 + $0xb0] sm:$0xff]  ;;  %v723_v35 = vpack.c.bf16 %v90_v32, %v86_v30  ;;  %v95_v36 = vld [vmem:[#allocation6 + $0xc8] sm:$0xff]  ;;  %v97_v38 = vld [vmem:[#allocation6 + $0xd8] sm:$0xff] }
  0x40   :  { %720 = vmatpush1.bf16.msra.mxu0 %v719_v22  ;;  %v99_v37 = vld [vmem:[#allocation6 + $0xe8] sm:$0xff]  ;;  %v755_v39 = vpack.c.bf16 %v92_v34, %v88_v33  ;;  %v101_v41 = vld [vmem:[#allocation6 + $0xf8] sm:$0xff]  ;;  %v94_v42 = vld [vmem:[#allocation6 + $0xc0] sm:$0xff] }
  0x41   :  { %752 = vmatpush1.bf16.msra.mxu1 %v751_v26  ;;  %722 = vmatprep.subr.bf16.mxu0 %v721_v27  ;;  %v725_v40 = vpack.c.bf16 %v99_v37, %v95_v36  ;;  %v98_v43 = vld [vmem:[#allocation6 + $0xe0] sm:$0xff]  ;;  %v757_v44 = vpack.c.bf16 %v101_v41, %v97_v38  ;;  %v96_v45 = vld [vmem:[#allocation6 + $0xd0] sm:$0xff]  ;;  %v103_v47 = vld [vmem:[#allocation6 + $0x108] sm:$0xff] }
  0x42   :  { %754 = vmatprep.subr.bf16.mxu1 %v753_v31  ;;  %v100_v46 = vld [vmem:[#allocation6 + $0xf0] sm:$0xff]  ;;  %v107_v48 = vld [vmem:[#allocation6 + $0x128] sm:$0xff]  ;;  %v105_v49 = vld [vmem:[#allocation6 + $0x118] sm:$0xff]  ;;  %v727_v51 = vpack.c.bf16 %v98_v43, %v94_v42 }
  0x43   :  { %v109_v50 = vld [vmem:[#allocation6 + $0x138] sm:$0xff]  ;;  %v759_v52 = vpack.c.bf16 %v100_v46, %v96_v45  ;;  %v729_v53 = vpack.c.bf16 %v107_v48, %v103_v47  ;;  %v102_v54 = vld [vmem:[#allocation6 + $0x100] sm:$0xff]  ;;  %v104_v56 = vld [vmem:[#allocation6 + $0x110] sm:$0xff] }
  0x44   :  { %724 = vmatpush1.bf16.msra.mxu0 %v723_v35  ;;  %v106_v55 = vld [vmem:[#allocation6 + $0x120] sm:$0xff]  ;;  %v761_v57 = vpack.c.bf16 %v109_v50, %v105_v49  ;;  %v108_v58 = vld [vmem:[#allocation6 + $0x130] sm:$0xff]  ;;  %v111_v59 = vld [vmem:[#allocation6 + $0x148] sm:$0xff] }
  0x45   :  { %756 = vmatpush1.bf16.msra.mxu1 %v755_v39  ;;  %726 = vmatprep.subr.bf16.mxu0 %v725_v40  ;;  %v115_v60 = vld [vmem:[#allocation6 + $0x168] sm:$0xff]  ;;  %v113_v61 = vld [vmem:[#allocation6 + $0x158] sm:$0xff]  ;;  %v731_v63 = vpack.c.bf16 %v106_v55, %v102_v54  ;;  %v763_v1 = vpack.c.bf16 %v108_v58, %v104_v56  ;;  %v110_v3 = vld [vmem:[#allocation6 + $0x140] sm:$0xff] }
  0x46   :  { %758 = vmatprep.subr.bf16.mxu1 %v757_v44  ;;  %v117_v62 = vld [vmem:[#allocation6 + $0x178] sm:$0xff]  ;;  %v733_v2 = vpack.c.bf16 %v115_v60, %v111_v59  ;;  %v114_v4 = vld [vmem:[#allocation6 + $0x160] sm:$0xff]  ;;  %v112_v5 = vld [vmem:[#allocation6 + $0x150] sm:$0xff] }
  0x47   :  { %v765_v6 = vpack.c.bf16 %v117_v62, %v113_v61  ;;  %v116_v7 = vld [vmem:[#allocation6 + $0x170] sm:$0xff]  ;;  %v119_v8 = vld [vmem:[#allocation6 + $0x188] sm:$0xff]  ;;  %v121_v10 = vld [vmem:[#allocation6 + $0x198] sm:$0xff]  ;;  %v735_v12 = vpack.c.bf16 %v114_v4, %v110_v3 }
  0x48   :  { %728 = vmatpush1.bf16.msra.mxu0 %v727_v51  ;;  %v123_v9 = vld [vmem:[#allocation6 + $0x1a8] sm:$0xff]  ;;  %v125_v11 = vld [vmem:[#allocation6 + $0x1b8] sm:$0xff]  ;;  %v767_v13 = vpack.c.bf16 %v116_v7, %v112_v5  ;;  %v118_v15 = vld [vmem:[#allocation6 + $0x180] sm:$0xff] }
  0x49   :  { %760 = vmatpush1.bf16.msra.mxu1 %v759_v52  ;;  %730 = vmatprep.subr.bf16.mxu0 %v729_v53  ;;  %v737_v14 = vpack.c.bf16 %v123_v9, %v119_v8  ;;  %v122_v16 = vld [vmem:[#allocation6 + $0x1a0] sm:$0xff]  ;;  %v120_v17 = vld [vmem:[#allocation6 + $0x190] sm:$0xff]  ;;  %v769_v18 = vpack.c.bf16 %v125_v11, %v121_v10  ;;  %v127_v20 = vld [vmem:[#allocation6 + $0x1c8] sm:$0xff] }
  0x4a   :  { %762 = vmatprep.subr.bf16.mxu1 %v761_v57  ;;  %v124_v19 = vld [vmem:[#allocation6 + $0x1b0] sm:$0xff]  ;;  %v131_v21 = vld [vmem:[#allocation6 + $0x1e8] sm:$0xff]  ;;  %v129_v22 = vld [vmem:[#allocation6 + $0x1d8] sm:$0xff]  ;;  %v739_v24 = vpack.c.bf16 %v122_v16, %v118_v15 }
  0x4b   :  { %v133_v23 = vld [vmem:[#allocation6 + $0x1f8] sm:$0xff]  ;;  %v771_v25 = vpack.c.bf16 %v124_v19, %v120_v17  ;;  %v741_v26 = vpack.c.bf16 %v131_v21, %v127_v20  ;;  %v126_v27 = vld [vmem:[#allocation6 + $0x1c0] sm:$0xff]  ;;  %v128_v29 = vld [vmem:[#allocation6 + $0x1d0] sm:$0xff] }
  0x4c   :  { %732 = vmatpush1.bf16.msra.mxu0 %v731_v63  ;;  %v130_v28 = vld [vmem:[#allocation6 + $0x1e0] sm:$0xff]  ;;  %v773_v30 = vpack.c.bf16 %v133_v23, %v129_v22  ;;  %v132_v31 = vld [vmem:[#allocation6 + $0x1f0] sm:$0xff]  ;;  %v401_v33 = vld [vmem:[#allocation8 + $0x88] sm:$0xff] }
  0x4d   :  { %764 = vmatpush1.bf16.msra.mxu1 %v763_v1  ;;  %734 = vmatprep.subr.bf16.mxu0 %v733_v2  ;;  %v400_v32 = vld [vmem:[#allocation8 + $0x80] sm:$0xff]  ;;  %v433_v35 = vld [vmem:[#allocation8 + $0x188] sm:$0xff]  ;;  %v743_v36 = vpack.c.bf16 %v130_v28, %v126_v27  ;;  %v775_v37 = vpack.c.bf16 %v132_v31, %v128_v29  ;;  %v68_v44 = vld [vmem:[#allocation3] sm:$0xff] }
  0x4e   :  { %766 = vmatprep.subr.bf16.mxu1 %v765_v6  ;;  %v432_v34 = vld [vmem:[#allocation8 + $0x180] sm:$0xff]  ;;  %v777_v38 = vpack.c.bf16 %v401_v33, %v400_v32  ;;  %v385_v41 = vld [vmem:[#allocation8 + $0x8] sm:$0xff]  ;;  %v69_v47 = vld [vmem:[#allocation3 + $0x8] sm:$0xff] }
  0x4f   :  { %v809_v39 = vpack.c.bf16 %v433_v35, %v432_v34  ;;  %v384_v40 = vld [vmem:[#allocation8] sm:$0xff]  ;;  %v417_v43 = vld [vmem:[#allocation8 + $0x108] sm:$0xff]  ;;  %v402_v48 = vld [vmem:[#allocation8 + $0x90] sm:$0xff] }
  0x50   :  { %736 = vmatpush1.bf16.msra.mxu0 %v735_v12  ;;  %v416_v42 = vld [vmem:[#allocation8 + $0x100] sm:$0xff]  ;;  %v779_v45 = vpack.c.bf16 %v385_v41, %v384_v40  ;;  %v403_v49 = vld [vmem:[#allocation8 + $0x98] sm:$0xff]  ;;  %v434_v50 = vld [vmem:[#allocation8 + $0x190] sm:$0xff] }
  0x51   :  { %768 = vmatpush1.bf16.msra.mxu1 %v767_v13  ;;  %738 = vmatprep.subr.bf16.mxu0 %v737_v14  ;;  %v811_v46 = vpack.c.bf16 %v417_v43, %v416_v42  ;;  %v781_v51 = vpack.c.bf16 %v403_v49, %v402_v48  ;;  %v435_v52 = vld [vmem:[#allocation8 + $0x198] sm:$0xff]  ;;  %v386_v54 = vld [vmem:[#allocation8 + $0x10] sm:$0xff]  ;;  %v405_v60 = vld [vmem:[#allocation8 + $0xa8] sm:$0xff] }
  0x52   :  { %770 = vmatprep.subr.bf16.mxu1 %v769_v18  ;;  %v813_v53 = vpack.c.bf16 %v435_v52, %v434_v50  ;;  %v387_v55 = vld [vmem:[#allocation8 + $0x18] sm:$0xff]  ;;  %v418_v56 = vld [vmem:[#allocation8 + $0x110] sm:$0xff]  ;;  %v436_v61 = vld [vmem:[#allocation8 + $0x1a0] sm:$0xff] }
  0x53   :  { %v783_v57 = vpack.c.bf16 %v387_v55, %v386_v54  ;;  %v419_v58 = vld [vmem:[#allocation8 + $0x118] sm:$0xff]  ;;  %v437_v63 = vld [vmem:[#allocation8 + $0x1a8] sm:$0xff]  ;;  %v388_v2 = vld [vmem:[#allocation8 + $0x20] sm:$0xff] }
  0x54   :  { %740 = vmatpush1.bf16.msra.mxu0 %v739_v24  ;;  %v815_v59 = vpack.c.bf16 %v419_v58, %v418_v56  ;;  %v817_v1 = vpack.c.bf16 %v437_v63, %v436_v61  ;;  %v389_v3 = vld [vmem:[#allocation8 + $0x28] sm:$0xff]  ;;  %v420_v4 = vld [vmem:[#allocation8 + $0x120] sm:$0xff]  ;;  %v406_v8 = vld [vmem:[#allocation8 + $0xb0] sm:$0xff] }
  0x55   :  { %772 = vmatpush1.bf16.msra.mxu1 %v771_v25  ;;  %742 = vmatprep.subr.bf16.mxu0 %v741_v26  ;;  %v787_v5 = vpack.c.bf16 %v389_v3, %v388_v2  ;;  %v421_v6 = vld [vmem:[#allocation8 + $0x128] sm:$0xff]  ;;  %v407_v9 = vld [vmem:[#allocation8 + $0xb8] sm:$0xff]  ;;  %v438_v10 = vld [vmem:[#allocation8 + $0x1b0] sm:$0xff] }
  0x56   :  { %774 = vmatprep.subr.bf16.mxu1 %v773_v30  ;;  %v819_v7 = vpack.c.bf16 %v421_v6, %v420_v4  ;;  %v789_v11 = vpack.c.bf16 %v407_v9, %v406_v8  ;;  %v439_v12 = vld [vmem:[#allocation8 + $0x1b8] sm:$0xff]  ;;  %v390_v13 = vld [vmem:[#allocation8 + $0x30] sm:$0xff]  ;;  %v408_v20 = vld [vmem:[#allocation8 + $0xc0] sm:$0xff]  ;;  %v136_v4 = vlaneseq }
  0x57   :  { %v391_v14 = vld [vmem:[#allocation8 + $0x38] sm:$0xff]  ;;  %v821_v15 = vpack.c.bf16 %v439_v12, %v438_v10  ;;  %v422_v17 = vld [vmem:[#allocation8 + $0x130] sm:$0xff]  ;;  %v409_v21 = vld [vmem:[#allocation8 + $0xc8] sm:$0xff] }
  0x58   :  { %744 = vmatpush1.bf16.msra.mxu0 %v743_v36  ;;  %v791_v16 = vpack.c.bf16 %v391_v14, %v390_v13  ;;  %v423_v18 = vld [vmem:[#allocation8 + $0x138] sm:$0xff]  ;;  %v440_v22 = vld [vmem:[#allocation8 + $0x1c0] sm:$0xff]  ;;  %v793_v23 = vpack.c.bf16 %v409_v21, %v408_v20  ;;  %v441_v24 = vld [vmem:[#allocation8 + $0x1c8] sm:$0xff] }
  0x59   :  { %776 = vmatpush1.bf16.msra.mxu1 %v775_v37  ;;  %778 = vmatprep.subr.bf16.mxu0 %v777_v38  ;;  %v823_v19 = vpack.c.bf16 %v423_v18, %v422_v17  ;;  %v392_v25 = vld [vmem:[#allocation8 + $0x40] sm:$0xff]  ;;  %v393_v26 = vld [vmem:[#allocation8 + $0x48] sm:$0xff]  ;;  %v825_v27 = vpack.c.bf16 %v441_v24, %v440_v22  ;;  %v410_v32 = vld [vmem:[#allocation8 + $0xd0] sm:$0xff] }
  0x5a   :  { %810 = vmatprep.subr.bf16.mxu1 %v809_v39  ;;  %v795_v28 = vpack.c.bf16 %v393_v26, %v392_v25  ;;  %v424_v29 = vld [vmem:[#allocation8 + $0x140] sm:$0xff]  ;;  %v425_v30 = vld [vmem:[#allocation8 + $0x148] sm:$0xff]  ;;  %v411_v33 = vld [vmem:[#allocation8 + $0xd8] sm:$0xff] }
  0x5b   :  { %221 = vmatmul.mubr.f32.vlgmr.msra.gmra.mrb[0].mxu0 %v68_v44  ;;  %v827_v31 = vpack.c.bf16 %v425_v30, %v424_v29  ;;  %v442_v34 = vld [vmem:[#allocation8 + $0x1d0] sm:$0xff]  ;;  %v797_v35 = vpack.c.bf16 %v411_v33, %v410_v32  ;;  %v443_v36 = vld [vmem:[#allocation8 + $0x1d8] sm:$0xff]  ;;  %v445_v48 = vld [vmem:[#allocation8 + $0x1e8] sm:$0xff] }
  0x5c   :  { %298 = vmatmul.mubr.f32.vlgmr.msra.gmra.mrb[0].mxu1 %v68_v44  ;;  %226 = vmatprep.mubr.f32.mxu0 %v967_v0  ;;  %v394_v37 = vld [vmem:[#allocation8 + $0x50] sm:$0xff]  ;;  %v395_v38 = vld [vmem:[#allocation8 + $0x58] sm:$0xff]  ;;  %v829_v39 = vpack.c.bf16 %v443_v36, %v442_v34  ;;  %v412_v44 = vld [vmem:[#allocation8 + $0xe0] sm:$0xff] }
  0x5d   :  { %303 = vmatprep.mubr.f32.mxu1 %v967_v0  ;;  %780 = vmatpush3.bf16.msra.mxu0 %v779_v45  ;;  %v404_v0 = vld [vmem:[#allocation8 + $0xa0] sm:$0xff]  ;;  %v799_v40 = vpack.c.bf16 %v395_v38, %v394_v37  ;;  %v426_v41 = vld [vmem:[#allocation8 + $0x150] sm:$0xff]  ;;  %v427_v42 = vld [vmem:[#allocation8 + $0x158] sm:$0xff] }
  0x5e   :  { %812 = vmatpush3.bf16.msra.mxu1 %v811_v46  ;;  %782 = vmatprep.subr.bf16.mxu0 %v781_v51  ;;  %v785_v62 = vpack.c.bf16 %v405_v60, %v404_v0  ;;  %v831_v43 = vpack.c.bf16 %v427_v42, %v426_v41  ;;  %v413_v45 = vld [vmem:[#allocation8 + $0xe8] sm:$0xff]  ;;  %v444_v46 = vld [vmem:[#allocation8 + $0x1e0] sm:$0xff]  ;;  %v414_v55 = vld [vmem:[#allocation8 + $0xf0] sm:$0xff] }
  0x5f   :  { %227 = vmatmul.mubr.f32.gmra.mrb[2].mxu0 %v69_v47  ;;  %814 = vmatprep.subr.bf16.mxu1 %v813_v53  ;;  %v396_v49 = vld [vmem:[#allocation8 + $0x60] sm:$0xff]  ;;  %v397_v50 = vld [vmem:[#allocation8 + $0x68] sm:$0xff]  ;;  %v833_v51 = vpack.c.bf16 %v445_v48, %v444_v46  ;;  %v446_v58 = vld [vmem:[#allocation8 + $0x1f0] sm:$0xff] }
  0x60   :  { %304 = vmatmul.mubr.f32.gmra.mrb[2].mxu1 %v69_v47  ;;  %v801_v47 = vpack.c.bf16 %v413_v45, %v412_v44  ;;  %v803_v52 = vpack.c.bf16 %v397_v50, %v396_v49  ;;  %v428_v53 = vld [vmem:[#allocation8 + $0x160] sm:$0xff]  ;;  %v429_v54 = vld [vmem:[#allocation8 + $0x168] sm:$0xff]  ;;  %v398_v61 = vld [vmem:[#allocation8 + $0x70] sm:$0xff] }
  0x61   :  { %784 = vmatpush3.bf16.msra.mxu0 %v783_v57  ;;  %v835_v56 = vpack.c.bf16 %v429_v54, %v428_v53  ;;  %v415_v57 = vld [vmem:[#allocation8 + $0xf8] sm:$0xff]  ;;  %v430_v63 = vld [vmem:[#allocation8 + $0x170] sm:$0xff] }
  0x62   :  { %816 = vmatpush3.bf16.msra.mxu1 %v815_v59  ;;  %786 = vmatprep.subr.bf16.mxu0 %v785_v62  ;;  %v447_v59 = vld [vmem:[#allocation8 + $0x1f8] sm:$0xff]  ;;  %v805_v0 = vpack.c.bf16 %v415_v57, %v414_v55 }
  0x63   :  { %818 = vmatprep.subr.bf16.mxu1 %v817_v1  ;;  %v837_v60 = vpack.c.bf16 %v447_v59, %v446_v58  ;;  %v399_v62 = vld [vmem:[#allocation8 + $0x78] sm:$0xff] }
  0x64   :  { %v807_v1 = vpack.c.bf16 %v399_v62, %v398_v61  ;;  %v431_v2 = vld [vmem:[#allocation8 + $0x178] sm:$0xff] }
  0x65   :  { %788 = vmatpush3.bf16.msra.mxu0 %v787_v5  ;;  %v839_v3 = vpack.c.bf16 %v431_v2, %v430_v63  ;;  %v137_v5 = vshrl.u32 %v136_v4, 7 }
  0x66   :  { %820 = vmatpush3.bf16.msra.mxu1 %v819_v7  ;;  %790 = vmatprep.subr.bf16.mxu0 %v789_v11  ;;  %v134_v7 = vld [vmem:[%s1104_s2] sm:$0xf] }
  0x67   :  { %822 = vmatprep.subr.bf16.mxu1 %v821_v15  ;;  %v138_v6 = vsub.s32 0, %v137_v5  ;;  %v146_v8 = vsub.s32 2, %v137_v5  ;;  %v142_v9 = vsub.s32 1, %v137_v5  ;;  %v150_v10 = vsub.s32 3, %v137_v5 }
  0x69   :  { %792 = vmatpush3.bf16.msra.mxu0 %v791_v16  ;;  %v139_v11 = vrot.slane %v134_v7, %v138_v6  ;;  %v147_v12 = vrot.slane %v134_v7, %v146_v8  ;;  %v143_v13 = vrot.slane %v134_v7, %v142_v9  ;;  %v151_v14 = vrot.slane %v134_v7, %v150_v10 }
  0x6a   :  { %824 = vmatpush3.bf16.msra.mxu1 %v823_v19  ;;  %794 = vmatprep.subr.bf16.mxu0 %v793_v23 }
  0x6b   :  { %826 = vmatprep.subr.bf16.mxu1 %v825_v27 }
  0x6d   :  { %796 = vmatpush3.bf16.msra.mxu0 %v795_v28 }
  0x6e   :  { %828 = vmatpush3.bf16.msra.mxu1 %v827_v31  ;;  %798 = vmatprep.subr.bf16.mxu0 %v797_v35 }
  0x6f   :  { %830 = vmatprep.subr.bf16.mxu1 %v829_v39 }
  0x71   :  { %800 = vmatpush3.bf16.msra.mxu0 %v799_v40 }
  0x72   :  { %832 = vmatpush3.bf16.msra.mxu1 %v831_v43  ;;  %802 = vmatprep.subr.bf16.mxu0 %v801_v47 }
  0x73   :  { %834 = vmatprep.subr.bf16.mxu1 %v833_v51 }
  0x75   :  { %804 = vmatpush3.bf16.msra.mxu0 %v803_v52 }
  0x76   :  { %836 = vmatpush3.bf16.msra.mxu1 %v835_v56  ;;  %806 = vmatprep.subr.bf16.mxu0 %v805_v0 }
  0x77   :  { %838 = vmatprep.subr.bf16.mxu1 %v837_v60 }
  0x79   :  { %808 = vmatpush3.bf16.msra.mxu0 %v807_v1 }
  0x7a   :  { %840 = vmatpush3.bf16.msra.mxu1 %v839_v3 }
 0x12e   :  { %v222_v15 = vpop.f32.mrb[0].mxu0 }
 0x12f   :  { %v1048_v16 = vadd.f32 %v222_v15, %v139_v11  ;;  %v299_v17 = vpop.f32.mrb[0].mxu1  ;;  %v224_v18 = vpop.f32.mrb[1].mxu0 }
 0x130   :  { %v1050_v19 = vadd.f32 %v299_v17, %v147_v12  ;;  %v1052_v20 = vadd.f32 %v224_v18, %v143_v13  ;;  %v301_v21 = vpop.f32.mrb[1].mxu1 }
 0x131   :  { %v326_v22 = vmul.f32 %v1048_v16, %v1048_v16  ;;  %v1056_v23 = vadd.f32 %v301_v21, %v151_v14  ;;  %v318_v29 = vmul.f32 0.7978846, %v1048_v16  ;;  %v310_v15 = vmul.f32 0.5, %v1048_v16 }
 0x132   :  { %v328_v24 = vmul.f32 %v1050_v19, %v1050_v19  ;;  %v228_v25 = vpop.f32.mrb[2].mxu0  ;;  %v327_v27 = vmul.f32 %v1052_v20, %v1052_v20  ;;  %v320_v36 = vmul.f32 0.7978846, %v1050_v19  ;;  %v319_v40 = vmul.f32 0.7978846, %v1052_v20 }
 0x133   :  { %v334_v26 = vmul.f32 0.044715, %v326_v22  ;;  %v305_v28 = vpop.f32.mrb[2].mxu1  ;;  %v329_v31 = vmul.f32 %v1056_v23, %v1056_v23  ;;  %v1065_v32 = vadd.f32 %v228_v25, %v139_v11  ;;  %v230_v33 = vpop.f32.mrb[3].mxu0  ;;  %v321_v47 = vmul.f32 0.7978846, %v1056_v23 }
 0x134   :  { %v336_v30 = vmul.f32 0.044715, %v328_v24  ;;  %v307_v34 = vpop.f32.mrb[3].mxu1  ;;  %v335_v37 = vmul.f32 0.044715, %v327_v27  ;;  %v1068_v38 = vadd.f32 %v305_v28, %v147_v12  ;;  %v231_v45 = vadd.f32 %v230_v33, %v143_v13 }
 0x135   :  { %v342_v35 = vadd.f32 1.0, %v334_v26  ;;  %v337_v41 = vmul.f32 0.044715, %v329_v31  ;;  %v330_v44 = vmul.f32 %v1065_v32, %v1065_v32  ;;  %v322_v53 = vmul.f32 0.7978846, %v1065_v32 }
 0x136   :  { %v344_v39 = vadd.f32 1.0, %v336_v30  ;;  %v343_v43 = vadd.f32 1.0, %v335_v37  ;;  %v332_v49 = vmul.f32 %v1068_v38, %v1068_v38  ;;  %v331_v56 = vmul.f32 %v231_v45, %v231_v45 }
 0x137   :  { %v350_v42 = vmul.f32 %v342_v35, %v318_v29  ;;  %v345_v48 = vadd.f32 1.0, %v337_v41  ;;  %v338_v51 = vmul.f32 0.044715, %v330_v44  ;;  %v308_v57 = vadd.f32 %v307_v34, %v151_v14 }
 0x138   :  { %v352_v46 = vmul.f32 %v344_v39, %v320_v36  ;;  %v351_v50 = vmul.f32 %v343_v43, %v319_v40  ;;  %v340_v54 = vmul.f32 0.044715, %v332_v49  ;;  %v324_v58 = vmul.f32 0.7978846, %v1068_v38 }
 0x139   :  { %850 = vtanh.f32 %v350_v42  ;;  %v353_v52 = vmul.f32 %v345_v48, %v321_v47  ;;  %v346_v55 = vadd.f32 1.0, %v338_v51  ;;  %v339_v60 = vmul.f32 0.044715, %v331_v56 }
 0x13a   :  { %852 = vtanh.f32 %v352_v46  ;;  %v348_v59 = vadd.f32 1.0, %v340_v54  ;;  %v333_v62 = vmul.f32 %v308_v57, %v308_v57  ;;  %v323_v63 = vmul.f32 0.7978846, %v231_v45  ;;  %v636_v46 = vld [vmem:[%s1106_s4] ss:$0 sm:$0xff] }
 0x13b   :  { %854 = vtanh.f32 %v351_v50  ;;  %v354_v0 = vmul.f32 %v346_v55, %v322_v53  ;;  %v347_v1 = vadd.f32 1.0, %v339_v60  ;;  %v325_v4 = vmul.f32 0.7978846, %v308_v57 }
 0x13c   :  { %856 = vtanh.f32 %v353_v52  ;;  %v356_v61 = vmul.f32 %v348_v59, %v324_v58  ;;  %v341_v2 = vmul.f32 0.044715, %v333_v62  ;;  %v311_v13 = vmul.f32 0.5, %v1052_v20 }
 0x13d   :  { %858 = vtanh.f32 %v354_v0  ;;  %v355_v3 = vmul.f32 %v347_v1, %v323_v63  ;;  %v313_v17 = vmul.f32 0.5, %v1056_v23  ;;  %v312_v21 = vmul.f32 0.5, %v1050_v19 }
 0x13e   :  { %860 = vtanh.f32 %v356_v61  ;;  %v349_v5 = vadd.f32 1.0, %v341_v2  ;;  %v315_v30 = vmul.f32 0.5, %v231_v45  ;;  %v314_v16 = vmul.f32 0.5, %v1065_v32 }
 0x13f   :  { %862 = vtanh.f32 %v355_v3  ;;  %v317_v19 = vmul.f32 0.5, %v308_v57  ;;  %v316_v37 = vmul.f32 0.5, %v1068_v38 }
 0x140   :  { %v357_v8 = vmul.f32 %v349_v5, %v325_v4 }
 0x142   :  { %864 = vtanh.f32 %v357_v8 }
 0x143   :  { %v851_v6 = vpop.eup %850 }
 0x144   :  { %v853_v7 = vpop.eup %852  ;;  %v366_v10 = vadd.f32 1.0, %v851_v6 }
 0x145   :  { %v855_v9 = vpop.eup %854  ;;  %v368_v12 = vadd.f32 1.0, %v853_v7 }
 0x146   :  { %v857_v11 = vpop.eup %856  ;;  %v367_v14 = vadd.f32 1.0, %v855_v9  ;;  %v374_v24 = vmul.f32 %v366_v10, %v310_v15 }
 0x147   :  { %v369_v18 = vadd.f32 1.0, %v857_v11  ;;  %v859_v26 = vpop.eup %858  ;;  %v376_v27 = vmul.f32 %v368_v12, %v312_v21 }
 0x148   :  { %v375_v22 = vmul.f32 %v367_v14, %v311_v13  ;;  %v861_v28 = vpop.eup %860  ;;  %v370_v29 = vadd.f32 1.0, %v859_v26 }
 0x149   :  { %v377_v25 = vmul.f32 %v369_v18, %v313_v17  ;;  %v863_v20 = vpop.eup %862  ;;  %v372_v34 = vadd.f32 1.0, %v861_v28 }
 0x14a   :  { %512 = vmatprep.mubr.f32.mxu0 %v375_v22  ;;  %v371_v31 = vadd.f32 1.0, %v863_v20  ;;  %v378_v36 = vmul.f32 %v370_v29, %v314_v16 }
 0x14b   :  { %587 = vmatprep.mubr.f32.mxu1 %v377_v25  ;;  %513 = vmatmul.mubr.f32.vlgmr.msra.gmra.mrb[4].mxu0 %v374_v24  ;;  %v380_v40 = vmul.f32 %v372_v34, %v316_v37 }
 0x14c   :  { %588 = vmatmul.mubr.f32.vlgmr.msra.gmra.mrb[4].mxu1 %v376_v27  ;;  %v865_v23 = vpop.eup %864  ;;  %v379_v33 = vmul.f32 %v371_v31, %v315_v30 }
 0x14d   :  { %v373_v35 = vadd.f32 1.0, %v865_v23 }
 0x14e   :  { %517 = vmatprep.mubr.f32.mxu0 %v379_v33 }
 0x14f   :  { %v381_v39 = vmul.f32 %v373_v35, %v317_v19  ;;  %518 = vmatmul.mubr.f32.gmra.mrb[6].mxu0 %v378_v36 }
 0x151   :  { %592 = vmatprep.mubr.f32.mxu1 %v381_v39 }
 0x152   :  { %593 = vmatmul.mubr.f32.gmra.mrb[6].mxu1 %v380_v40 }
 0x21e   :  { %v669_v41 = vpop.f32.mrb[4].mxu0 }
 0x21f   :  { %v707_v42 = vpop.f32.mrb[4].mxu1  ;;  %v670_v43 = vpop.f32.mrb[5].mxu0 }
 0x220   :  { %v671_v44 = vadd.f32 %v670_v43, %v669_v41  ;;  %v708_v45 = vpop.f32.mrb[5].mxu1 }
 0x221   :  { %v709_v32 = vadd.f32 %v708_v45, %v707_v42 }
 0x222   :  { %v672_v49 = vpop.f32.mrb[6].mxu0 }
 0x223   :  { %v590_v47 = vadd.f32 %v709_v32, %v671_v44  ;;  %v673_v38 = vpop.f32.mrb[7].mxu0 }
 0x224   :  { %v674_v50 = vadd.f32 %v673_v38, %v672_v49 }
 0x225   :  { %v614_v48 = vadd.f32 %v636_v46, %v590_v47  ;;  %v710_v51 = vpop.f32.mrb[6].mxu1 }
 0x226   :  { %v711_v52 = vpop.f32.mrb[7].mxu1 }
 0x227   :  { %616 = vst [vmem:[#allocation9] sm:$0xff] %v614_v48  ;;  %v712_v53 = vadd.f32 %v711_v52, %v710_v51 }
 0x229   :  { %v595_v54 = vadd.f32 %v712_v53, %v674_v50 }
 0x22b   :  { %v615_v55 = vadd.f32 %v636_v46, %v595_v54 }
 0x22d   :  { %617 = vst [vmem:[#allocation9 + $0x8] sm:$0xff] %v615_v55 }
 0x22e   :  { %943 = shalt.err (!%p940_p0)
}
 0x22f   :  { %s944_s12 = scalar_lea.hbm %s1107_s5, 256 }
 0x230   :  { %p945_p1 = scmp.ne.s32.totalorder %s1107_s5, %s944_s12  ;;  %p948_p2 = scmp.lt.u32.totalorder %s944_s12, %s1107_s5 }
 0x232   :  { %p950_p3 = pnand %p948_p2, %p945_p1 }
 0x234   :  { %953 = shalt.err (!%p950_p3)
}
 0x235   :  { %629 = dma.vmem_to_hbm [thread:$0]  %s624_s9, 256, %s1107_s5, [#allocation5], %s964_s1, %s964_s1, %s965_s17  }
 0x236   :  { %958 = dma.done.wait [#allocation5], 256  }
 0x237   :  { %959 = vsyncadd [#allocation5], 4294967040 }
 0x238   :  { %633 = vsyncpa [#allocation4], 1 }
 0x239   :  { %634 = vsyncpa [#allocation7], 1 }
 0x23a   :  { %635 = vsyncpa [#allocation5], 1 }

</bundles_post_ra>
